<compile_context>
chip_gen: v5e
topology: v5e:2x2
jax: 0.10.0
libtpu: 0.0.40
codegen_flags: <defaults>
</compile_context>

<pallas_src>
import jax
import jax.numpy as jnp
from jax.experimental import pallas as pl
from jax.experimental.pallas import tpu as pltpu


def _mlp_kernel(x_ref, w1_ref, b1_ref, w2_ref, b2_ref, o_ref):
    # One (packed) batch tile, fully VMEM-resident.
    x = x_ref[...]                                                     # (TBp, Fp) bf16
    h = jnp.dot(x, w1_ref[...], preferred_element_type=jnp.float32)    # MXU, f32 acc
    h = jnp.maximum(h + b1_ref[...], 0.0)                              # bias + ReLU (f32)
    y = jnp.dot(h.astype(w2_ref.dtype), w2_ref[...],
                preferred_element_type=jnp.float32)                    # MXU, f32 acc
    o_ref[...] = (y + b2_ref[...]).astype(o_ref.dtype)                 # (TBp, Op)


def _block_diag(w, p):
    """(n, m) -> (n*p, m*p) block-diagonal matrix holding p copies of w."""
    if p == 1:
        return w
    n, m = w.shape
    eye = jnp.eye(p, dtype=w.dtype)
    return (eye[:, None, :, None] * w[None, :, None, :]).reshape(n * p, m * p)


def _padded_tile_bytes(rows, cols, itemsize):
    """VMEM bytes of one (rows, cols) block after (8, 128) layout padding."""
    return (-(-rows // 8) * 8) * (-(-cols // 128) * 128) * itemsize


def mini_nn_forward(x, w1, b1, w2, b2, *, batch_tile=4096, out_dtype=jnp.bfloat16):
    """Fused MLP forward: relu(x @ w1 + b1) @ w2 + b2.

    x:  (B, F) activations (bf16 recommended for HBM-bandwidth-bound streaming).
    w1: (F, 16), b1: (1, 16), w2: (16, O), b2: (1, O).
    Returns (B, O) in `out_dtype` (default bf16; pass jnp.float32 if downstream
    needs full precision).
    """
    B, F = x.shape
    H = w1.shape[1]
    O = w2.shape[1]

    # ---- lane-packing factor: pack P rows of F features into one 128-wide row ----
    P = 128 // F if (F <= 128 and 128 % F == 0) else 1
    Fp, Hp, Op = F * P, H * P, O * P

    # Weights follow the activation streaming dtype; biases stay f32 (post-MXU add).
    w1_bd = _block_diag(w1.astype(x.dtype), P)          # (Fp, Hp)
    w2_bd = _block_diag(w2.astype(x.dtype), P)          # (Hp, Op)
    b1_t = jnp.tile(b1.astype(jnp.float32), (1, P))     # (1, Hp)
    b2_t = jnp.tile(b2.astype(jnp.float32), (1, P))     # (1, Op)

    # Pad B to a multiple of P and fold P rows into the lane dimension (free reshape).
    B_pad = -(-B // P) * P
    x_pad = jnp.pad(x, ((0, B_pad - B), (0, 0))) if B_pad != B else x
    xp = x_pad.reshape(B_pad // P, Fp)                  # (Bp, Fp), lane-dense
    Bp = B_pad // P

    # ---- packed-row batch tile ----
    cap_p = max(8, (batch_tile // P) // 8 * 8)          # cap in packed rows, 8-aligned
    if Bp <= cap_p:
        if Bp >= 16:
            # Split into 2 tiles so the "parallel" axis spans both v7x TensorCores.
            TBp = -(-(-(-Bp // 2)) // 8) * 8            # round_up(ceil(Bp/2), 8)
        else:
            TBp = Bp                                    # tiny: one full-extent block
    else:
        TBp = cap_p
    num_steps = pl.cdiv(Bp, TBp)
    grid = (num_steps,)

    # ---- honest VMEM accounting (with (8,128) lane/sublane padding) + explicit limit ----
    x_it = jnp.dtype(x.dtype).itemsize
    w_it = x_it
    out_it = jnp.dtype(out_dtype).itemsize
    n_x_buf = 3 if num_steps >= 3 else 2                # triple-buffer the x stream
    est = (n_x_buf * _padded_tile_bytes(TBp, Fp, x_it)
           + 2 * _padded_tile_bytes(TBp, Op, out_it)
           + 2 * (_padded_tile_bytes(Fp, Hp, w_it) + _padded_tile_bytes(1, Hp, 4)
                  + _padded_tile_bytes(Hp, Op, w_it) + _padded_tile_bytes(1, Op, 4)))
    vmem_limit = int(min(max(2 * est + (2 << 20), 16 << 20), 64 << 20))

    cost = pl.CostEstimate(
        flops=2 * Bp * (Fp * Hp + Hp * Op),             # actual MXU work (incl. zero blocks)
        transcendentals=0,
        bytes_accessed=(Bp * Fp * x_it + Bp * Op * out_it
                        + (Fp * Hp + Hp * Op) * w_it + (Hp + Op) * 4),
    )

    if num_steps >= 3:
        x_spec = pl.BlockSpec((TBp, Fp), lambda i: (i, 0),
                              pipeline_mode=pl.Buffered(3))
    else:
        x_spec = pl.BlockSpec((TBp, Fp), lambda i: (i, 0))

    yp = pl.pallas_call(
        _mlp_kernel,
        out_shape=jax.ShapeDtypeStruct((Bp, Op), out_dtype),
        grid_spec=pl.GridSpec(
            grid=grid,
            in_specs=[
                x_spec,                                  # streamed / pipelined, lane-dense
                pl.BlockSpec((Fp, Hp), lambda i: (0, 0)),  # VMEM-resident weights
                pl.BlockSpec((1, Hp), lambda i: (0, 0)),
                pl.BlockSpec((Hp, Op), lambda i: (0, 0)),
                pl.BlockSpec((1, Op), lambda i: (0, 0)),
            ],
            out_specs=pl.BlockSpec((TBp, Op), lambda i: (i, 0)),
        ),
        compiler_params=pltpu.CompilerParams(
            dimension_semantics=("parallel",),           # megacore split on v7x
            vmem_limit_bytes=vmem_limit),
        cost_estimate=cost,
    )(xp, w1_bd, b1_t, w2_bd, b2_t)

    # Unpack lanes back to (B, O) — contiguous reshape, free.
    return yp.reshape(B_pad, O)[:B]


def init_params(key, feature_size, hidden_size, output_size):
    """Deterministic init mimicking nn.Linear's default uniform(-1/sqrt(fan_in), +)."""
    k1, k2, k3, k4 = jax.random.split(key, 4)
    bound1 = 1.0 / jnp.sqrt(feature_size)
    bound2 = 1.0 / jnp.sqrt(hidden_size)
    w1 = jax.random.uniform(k1, (feature_size, hidden_size), jnp.float32,
                            -bound1, bound1)
    b1 = jax.random.uniform(k2, (1, hidden_size), jnp.float32, -bound1, bound1)
    w2 = jax.random.uniform(k3, (hidden_size, output_size), jnp.float32,
                            -bound2, bound2)
    b2 = jax.random.uniform(k4, (1, output_size), jnp.float32, -bound2, bound2)
    return w1, b1, w2, b2


if __name__ == "__main__":
    key = jax.random.PRNGKey(0)
    k_x, k_p = jax.random.split(key)

    batch = 2
    feature_size = 32
    hidden_size = 16
    output_size = 8

    # Activations arrive in bf16 (upstream bf16 storage) — halves HBM read traffic.
    x = jax.random.normal(k_x, (batch, feature_size), jnp.float32).astype(jnp.bfloat16)
    w1, b1, w2, b2 = init_params(k_p, feature_size, hidden_size, output_size)

    out = mini_nn_forward(x, w1, b1, w2, b2)
    out = jax.block_until_ready(out)

    # Pure-JAX reference of the same math (bf16 inputs/weights, f32 accumulate,
    # f32 bias+ReLU, bf16 re-cast of h before the second matmul).
    xf = x.astype(jnp.float32)
    w1f = w1.astype(jnp.bfloat16).astype(jnp.float32)
    w2f = w2.astype(jnp.bfloat16).astype(jnp.float32)
    h_ref = jnp.maximum(xf @ w1f + b1, 0.0)
    ref = h_ref.astype(jnp.bfloat16).astype(jnp.float32) @ w2f + b2

    assert out.shape == (batch, output_size)
    assert out.dtype == jnp.bfloat16
    assert jnp.allclose(out.astype(jnp.float32), ref, atol=3e-2, rtol=3e-2)

    print("KERNEL_OK")
</pallas_src>

<mosaic_0001>
module attributes {stable_mosaic.version = 11 : i64} {
  func.func @_mlp_kernel(%arg0: i32, %arg1: memref<1x128xbf16, #tpu.memory_space<vmem>>, %arg2: memref<128x64xbf16, #tpu.memory_space<vmem>>, %arg3: memref<1x64xf32, #tpu.memory_space<vmem>>, %arg4: memref<64x32xbf16, #tpu.memory_space<vmem>>, %arg5: memref<1x32xf32, #tpu.memory_space<vmem>>, %arg6: memref<1x32xbf16, #tpu.memory_space<vmem>>) attributes {dimension_semantics = [#tpu.dimension_semantics<parallel>], iteration_bounds = array<i64: 1>, scalar_prefetch = 0 : i64, scratch_operands = 0 : i64, tpu.core_type = #tpu.core_type<tc>, window_params = [{transform_indices = @transform_0, window_bounds = array<i64: 1, 128>}, {pipeline_mode = #tpu.pipeline_mode<synchronous>, transform_indices = @transform_1, window_bounds = array<i64: 128, 64>}, {pipeline_mode = #tpu.pipeline_mode<synchronous>, transform_indices = @transform_2, window_bounds = array<i64: 1, 64>}, {pipeline_mode = #tpu.pipeline_mode<synchronous>, transform_indices = @transform_3, window_bounds = array<i64: 64, 32>}, {pipeline_mode = #tpu.pipeline_mode<synchronous>, transform_indices = @transform_4, window_bounds = array<i64: 1, 32>}, {transform_indices = @transform_5, window_bounds = array<i64: 1, 32>}]} {
    %c0 = arith.constant 0 : index
    %c0_0 = arith.constant 0 : index
    %0 = vector.load %arg1[%c0, %c0_0] : memref<1x128xbf16, #tpu.memory_space<vmem>>, vector<1x128xbf16>
    %c0_1 = arith.constant 0 : index
    %c0_2 = arith.constant 0 : index
    %1 = vector.load %arg2[%c0_1, %c0_2] : memref<128x64xbf16, #tpu.memory_space<vmem>>, vector<128x64xbf16>
    %cst = arith.constant dense<0.000000e+00> : vector<1x64xf32>
    %2 = tpu.matmul %0, %1, %cst {dimension_numbers = #tpu.dot_dimension_numbers<[1], [0], [0], [1], [0, 0, 1, 1], [], []>} : vector<1x128xbf16>, vector<128x64xbf16>, vector<1x64xf32> -> vector<1x64xf32>
    %c0_3 = arith.constant 0 : index
    %c0_4 = arith.constant 0 : index
    %3 = vector.load %arg3[%c0_3, %c0_4] : memref<1x64xf32, #tpu.memory_space<vmem>>, vector<1x64xf32>
    %4 = arith.addf %2, %3 : vector<1x64xf32>
    %cst_5 = arith.constant 0.000000e+00 : f32
    %5 = vector.broadcast %cst_5 : f32 to vector<1x64xf32>
    %6 = arith.maximumf %4, %5 : vector<1x64xf32>
    %7 = arith.truncf %6 : vector<1x64xf32> to vector<1x64xbf16>
    %c0_6 = arith.constant 0 : index
    %c0_7 = arith.constant 0 : index
    %8 = vector.load %arg4[%c0_6, %c0_7] : memref<64x32xbf16, #tpu.memory_space<vmem>>, vector<64x32xbf16>
    %cst_8 = arith.constant dense<0.000000e+00> : vector<1x32xf32>
    %9 = tpu.matmul %7, %8, %cst_8 {dimension_numbers = #tpu.dot_dimension_numbers<[1], [0], [0], [1], [0, 0, 1, 1], [], []>} : vector<1x64xbf16>, vector<64x32xbf16>, vector<1x32xf32> -> vector<1x32xf32>
    %c0_9 = arith.constant 0 : index
    %c0_10 = arith.constant 0 : index
    %10 = vector.load %arg5[%c0_9, %c0_10] : memref<1x32xf32, #tpu.memory_space<vmem>>, vector<1x32xf32>
    %11 = arith.addf %9, %10 : vector<1x32xf32>
    %12 = arith.truncf %11 : vector<1x32xf32> to vector<1x32xbf16>
    %c0_11 = arith.constant 0 : index
    %c0_12 = arith.constant 0 : index
    %13 = vector.load %arg6[%c0_11, %c0_12] : memref<1x32xbf16, #tpu.memory_space<vmem>>, vector<1x32xbf16>
    tpu.vector_store %arg6[%c0_11, %c0_12], %12 {strides = array<i32>} : memref<1x32xbf16, #tpu.memory_space<vmem>>, vector<1x32xbf16>,
    return
  }
  func.func @transform_0(%arg0: i32) -> (i32, i32) {
    %c0_i32 = arith.constant 0 : i32
    %c0_i32_0 = arith.constant 0 : i32
    return %arg0, %c0_i32 : i32, i32
  }
  func.func @transform_1(%arg0: i32) -> (i32, i32) {
    %c0_i32 = arith.constant 0 : i32
    %c0_i32_0 = arith.constant 0 : i32
    %c0_i32_1 = arith.constant 0 : i32
    return %c0_i32, %c0_i32_0 : i32, i32
  }
  func.func @transform_2(%arg0: i32) -> (i32, i32) {
    %c0_i32 = arith.constant 0 : i32
    %c0_i32_0 = arith.constant 0 : i32
    %c0_i32_1 = arith.constant 0 : i32
    return %c0_i32, %c0_i32_0 : i32, i32
  }
  func.func @transform_3(%arg0: i32) -> (i32, i32) {
    %c0_i32 = arith.constant 0 : i32
    %c0_i32_0 = arith.constant 0 : i32
    %c0_i32_1 = arith.constant 0 : i32
    return %c0_i32, %c0_i32_0 : i32, i32
  }
  func.func @transform_4(%arg0: i32) -> (i32, i32) {
    %c0_i32 = arith.constant 0 : i32
    %c0_i32_0 = arith.constant 0 : i32
    %c0_i32_1 = arith.constant 0 : i32
    return %c0_i32, %c0_i32_0 : i32, i32
  }
  func.func @transform_5(%arg0: i32) -> (i32, i32) {
    %c0_i32 = arith.constant 0 : i32
    %c0_i32_0 = arith.constant 0 : i32
    return %arg0, %c0_i32 : i32, i32
  }
}

</mosaic_0001>

<bundles_post_ra>
// kernel: tpu_custom_call.1
= control target key start
LH: loop header
LB: loop body
LE: loop exit
PB: predicated region body
PF: predicated region fallthrough
CT: control target
= control target key end

     0   :  { %s343_s0 = inlined_call_operand.vmem [shape: bf16[1,128], index: 0, kind: input, shape index: {}]   ;;  %s344_s1 = inlined_call_operand.vmem [shape: bf16[128,64], index: 1, kind: input, shape index: {}]   ;;  %s345_s2 = inlined_call_operand.vmem [shape: f32[1,64], index: 2, kind: input, shape index: {}]   ;;  %s346_s3 = inlined_call_operand.vmem [shape: bf16[64,32], index: 3, kind: input, shape index: {}]   ;;  %s347_s4 = inlined_call_operand.vmem [shape: f32[1,32], index: 4, kind: input, shape index: {}]   ;;  %s348_s5 = inlined_call_operand.hbm [shape: bf16[1,32], index: 5, kind: output, shape index: {}]  }
   0x1   :  { %v232_v0 = vld [vmem:[%s344_s1 + $0x38] sm:$0xff]  ;;  %v231_v1 = vld [vmem:[%s344_s1 + $0x30] sm:$0xff] }
   0x2   :  { %88 = vmatpush.bf16.msra.mxu0 %v232_v0  ;;  %v236_v2 = vld [vmem:[%s346_s3 + $0x18] sm:$0xff] }
   0x3   :  { %10 = vsyncpa [#allocation3], 0  ;;  %144 = vmatpush.bf16.msra.mxu1 %v236_v2  ;;  %v235_v3 = vld [vmem:[%s346_s3 + $0x10] sm:$0xff]  ;;  %v230_v4 = vld [vmem:[%s344_s1 + $0x28] sm:$0xff]  ;;  %vm136_vm0 = vcmask 523264   ;;  %vm154_vm1 = vcmask 253952  }
   0x4   :  { %v229_v5 = vld [vmem:[%s344_s1 + $0x20] sm:$0xff]  ;;  %v228_v6 = vld [vmem:[%s344_s1 + $0x18] sm:$0xff]  ;;  %v227_v7 = vld [vmem:[%s344_s1 + $0x10] sm:$0xff]  ;;  %vm155_vm2 = vsmask.f32 256 }
   0x5   :  { %v226_v8 = vld [vmem:[%s344_s1 + $0x8] sm:$0xff]  ;;  %v225_v9 = vld [vmem:[%s344_s1] sm:$0xff]  ;;  %vm156_vm3 = vmand %vm154_vm1, %vm155_vm2 }
   0x6   :  { %89 = vmatpush.bf16.msra.mxu0 %v231_v1  ;;  %v22_v10 = vld [vmem:[%s343_s0] sm:$0x1]  ;;  %v234_v11 = vld [vmem:[%s346_s3 + $0x8] sm:$0xff] }
   0x7   :  { %145 = vmatpush.bf16.msra.mxu1 %v235_v3  ;;  %v233_v12 = vld [vmem:[%s346_s3] sm:$0xff]  ;;  %s264_s3 = smov [#allocation2]  }
   0x8   :  { %v39_v13 = vld [vmem:[%s345_s2] sm:$0x1]  ;;  %s165_s21 = sshll.u32 %s264_s3, 4  ;;  %s167_s2 = sshll.u32 %s348_s5, 4  ;;  %s166_s21 = int_to_ptr.vmem [resolvable:$true] %s165_s21  ;;  %s168_s2 = int_to_ptr.hbm [resolvable:$true] %s167_s2 }
   0x9   :  { %v111_v19 = vld [vmem:[%s347_s4] sm:$0x1] }
   0xa   :  { %90 = vmatpush.bf16.msra.mxu0 %v230_v4  ;;  %v157_v22 = vld [vmem:[#allocation2] sm:$0x1] }
   0xb   :  { %146 = vmatpush.bf16.msra.mxu1 %v234_v11 }
   0xe   :  { %91 = vmatpush.bf16.msra.mxu0 %v229_v5 }
   0xf   :  { %147 = vmatpush.bf16.msra.mxu1 %v233_v12 }
  0x12   :  { %92 = vmatpush.bf16.msra.mxu0 %v228_v6 }
  0x16   :  { %93 = vmatpush.bf16.msra.mxu0 %v227_v7 }
  0x1a   :  { %94 = vmatpush.bf16.msra.mxu0 %v226_v8 }
  0x1e   :  { %95 = vmatpush.bf16.msra.mxu0 %v225_v9 }
  0x21   :  { %96 = vmatmul.bf16.vlgmr.msra.gmra.mxu0 %v22_v10 }
  0x9e   :  { %v97_v14 = vpop.f32.mrf.mxu0 }
  0x9f   :  { %v98_v15 = vadd.f32 %v97_v14, %v39_v13 }
  0xa1   :  { %v101_v16 = vmax.f32 %v98_v15, 0.0 }
  0xa3   :  { %v102_v17 = vpack.c.bf16 %v101_v16, %v101_v16 }
  0xa5   :  { %224 = vmatmul.msk.bf16.vlgmr.msra.gmra.mxu1 %vm136_vm0, %v102_v17 }
  0xa6   :  { %v99_v18 = vpop.f32.mrf.mxu0 }
 0x122   :  { %v149_v20 = vpop.f32.mrf.mxu1 }
 0x123   :  { %v150_v21 = vadd.f32 %v149_v20, %v111_v19 }
 0x125   :  { %v153_v23 = vpack.c.bf16 %v150_v21, %v150_v21 }
 0x127   :  { %v158_v24 = vsel %vm156_vm3, %v153_v23, %v157_v22 }
 0x128   :  { %159 = vst [vmem:[#allocation2] sm:$0x1] %v158_v24 }
 0x129   :  { %170 = dma.vmem_to_hbm [thread:$0]  %s166_s21, 16, %s168_s2, [#allocation3]  }
 0x12a   :  { %v151_v25 = vpop.f32.mrf.mxu1 }
 0x12b   :  { %262 = dma.done.wait [#allocation3], 16  }
 0x12c   :  { %263 = vsyncadd [#allocation3], 4294967280 }
 0x12d   :  { %175 = vsyncpa [#allocation3], 1 }

</bundles_post_ra>
